<compile_context>
chip_gen: v7x
topology: tpu7x:2x2x1
jax: 0.10.0
libtpu: 0.0.40
codegen_flags: <defaults>
</compile_context>

<pallas_src>
import jax
import jax.numpy as jnp
import numpy as np
from jax.experimental import pallas as pl
from jax.experimental.pallas import tpu as pltpu


def conv_relu_pool_kernel(w_ref, b_ref, x_ref, o_ref):
    """Fused Conv3d(k=(1,2,2)) + bias + ReLU + MaxPool3d(k=(1,2,2), stride=1), one shot.

    w_ref : SMEM (36,)          f32  -- conv weights flattened as (c, kh, kw)
    b_ref : SMEM (1,)           f32  -- conv bias
    x_ref : VMEM (C, Hp, L)     f32  -- H/W-padded input, lane axis packs (n, d, w)
                                        in groups of Wp=10 per (n, d) slab
    o_ref : VMEM (Ho, L-2)      f32  -- pooled output in the same lane packing
                                        (only the first 8 columns of each group of
                                         10 are meaningful; wrapper strips the rest)
    """
    C, Hp, L = x_ref.shape          # 9, 10, 120
    Hc = Hp - 1                     # conv rows   = 9
    Lc = L - 1                      # conv lanes  = 119
    Ho, Lo = o_ref.shape            # pooled rows = 8, pooled lanes = 118

    x = x_ref[...]                  # (C, Hp, L), loaded once

    # --- channel reduction on UNSHIFTED data: s_khkw = sum_c w[c,kh,kw] * x[c] ---
    s00 = s01 = s10 = s11 = None
    for c in range(C):
        xc = x[c]                                   # (Hp, L), aligned, no shift
        w0 = w_ref[4 * c + 0]
        w1 = w_ref[4 * c + 1]
        w2 = w_ref[4 * c + 2]
        w3 = w_ref[4 * c + 3]
        if c == 0:
            s00, s01, s10, s11 = xc * w0, xc * w1, xc * w2, xc * w3
        else:
            s00 = s00 + xc * w0
            s01 = s01 + xc * w1
            s10 = s10 + xc * w2
            s11 = s11 + xc * w3

    # --- 2x2 spatial conv: only 4 shifted slices now ---
    # Row shift kh = sublane slice; col shift kw = flat lane slice.  Lane groups are
    # Wp=10 wide; every *valid* conv column w' <= 8 only reads columns w'+kw <= 9 of
    # the SAME group, so the flat-lane shift never mixes (n, d) slabs where it matters.
    conv = (s00[0:Hc, 0:Lc] + s01[0:Hc, 1:1 + Lc]
            + s10[1:1 + Hc, 0:Lc] + s11[1:1 + Hc, 1:1 + Lc])    # (9, 119)

    # --- bias + ReLU ---
    r = jnp.maximum(conv + b_ref[0], 0.0)

    # --- 2x2 max pool, stride 1 (valid pool columns w <= 7 read conv columns <= 8) ---
    pooled = jnp.maximum(
        jnp.maximum(r[0:Ho, 0:Lo], r[0:Ho, 1:1 + Lo]),
        jnp.maximum(r[1:1 + Ho, 0:Lo], r[1:1 + Ho, 1:1 + Lo]),
    )                                                            # (8, 118)

    o_ref[...] = pooled                                          # single lane-dense store


@jax.jit
def c3d_forward(x, conv_w, conv_b):
    """x: (N, 9, D, H, W) f32.  Returns view(-1, 8, 8) like the PyTorch forward."""
    N, C, D, H, W = x.shape
    assert C == 9 and H == 8 and W == 8
    Hp, Wp = H + 2, W + 2            # spatial padding (1,1) on H and W
    ND = N * D
    L = ND * Wp                      # packed lane axis: (n, d, w) groups of Wp
    Ho, Wo = H, W                    # pooled spatial size

    x = x.astype(jnp.float32)
    # Pad H, W only (depth padding handled analytically below), then pack slabs
    # along the lane axis: (C, Hp, N*D*Wp).
    xp = jnp.pad(x, ((0, 0), (0, 0), (0, 0), (1, 1), (1, 1)))            # (N,C,D,Hp,Wp)
    xk = xp.transpose(1, 3, 0, 2, 4).reshape(C, Hp, L)                   # (9, 10, 120)

    w_flat = conv_w.reshape(-1).astype(jnp.float32)                      # (36,) = (c,kh,kw)
    b = conv_b.astype(jnp.float32)                                       # (1,)

    res = pl.pallas_call(
        conv_relu_pool_kernel,
        out_shape=jax.ShapeDtypeStruct((Ho, L - 2), jnp.float32),        # (8, 118)
        grid=(1,),
        in_specs=[
            pl.BlockSpec(memory_space=pltpu.MemorySpace.SMEM),           # weights
            pl.BlockSpec(memory_space=pltpu.MemorySpace.SMEM),           # bias
            pl.BlockSpec((C, Hp, L), lambda i: (0, 0, 0)),               # full input block
        ],
        out_specs=pl.BlockSpec((Ho, L - 2), lambda i: (0, 0)),
        compiler_params=pltpu.CompilerParams(
            dimension_semantics=("arbitrary",)),
    )(w_flat, b, xk)

    # Unpack lane groups of Wp back to (N, D, Ho, Wo); last 2 columns of each group
    # (and the 2 missing trailing lanes) are junk by construction.
    res = jnp.pad(res, ((0, 0), (0, 2)))                                 # (8, 120)
    main = res.reshape(Ho, N, D, Wp)[..., :Wo].transpose(1, 2, 0, 3)     # (N, D, 8, 8)

    # Depth padding planes: conv kernel depth extent is 1, so padded depth slices see
    # all-zero input -> conv = bias -> relu(bias) -> maxpool of a constant = relu(bias).
    edge = jnp.maximum(b[0], 0.0)
    edge_plane = jnp.full((N, 1, Ho, Wo), edge, jnp.float32)
    full = jnp.concatenate([edge_plane, main, edge_plane], axis=1)       # (N, D+2, 8, 8)

    # TODO(synk): dropout implemented as inference-mode identity; training-mode RNG mask not replicated.
    # h.view(-1, 8, 8)
    return full.reshape(-1, 8, 8)


def c3d_reference(x, conv_w, conv_b):
    """Pure-JAX reference of the same forward pass for verification."""
    xp = jnp.pad(x, ((0, 0), (0, 0), (1, 1), (1, 1), (1, 1))).astype(jnp.float32)
    N, C, Dp, Hp, Wp = xp.shape
    Hc, Wc = Hp - 1, Wp - 1
    w = conv_w.reshape(C, 2, 2).astype(jnp.float32)
    conv = jnp.zeros((N, Dp, Hc, Wc), jnp.float32)
    for kh in range(2):
        for kw in range(2):
            conv = conv + jnp.einsum(
                'ncdhw,c->ndhw', xp[:, :, :, kh:kh + Hc, kw:kw + Wc], w[:, kh, kw])
    r = jax.nn.relu(conv + conv_b[0])
    Ho, Wo = Hc - 1, Wc - 1
    pooled = jnp.maximum(
        jnp.maximum(r[..., 0:Ho, 0:Wo], r[..., 0:Ho, 1:1 + Wo]),
        jnp.maximum(r[..., 1:1 + Ho, 0:Wo], r[..., 1:1 + Ho, 1:1 + Wo]),
    )
    return pooled.reshape(-1, 8, 8)


if __name__ == "__main__":
    key = jax.random.PRNGKey(0)
    k_w, k_b, k_x = jax.random.split(key, 3)

    # conv1: Conv3d(9, 1, kernel_size=(1, 2, 2), padding=(1, 1, 1))
    fan_in = 9 * 1 * 2 * 2
    bound = 1.0 / float(np.sqrt(fan_in))
    conv_w = jax.random.uniform(k_w, (1, 9, 1, 2, 2), jnp.float32, -bound, bound)
    conv_b = jax.random.uniform(k_b, (1,), jnp.float32, -bound, bound)
    # (fc8 Linear(1728, 192) is defined in __init__ but never used in forward.)

    # Input: N=2, C=9 (required by conv1), D=6, H=W=8  ->  output view is (16, 8, 8)
    x = jax.random.normal(k_x, (2, 9, 6, 8, 8), jnp.float32)

    out = jax.block_until_ready(c3d_forward(x, conv_w, conv_b))
    ref = jax.block_until_ready(c3d_reference(x, conv_w, conv_b))

    assert out.shape == (16, 8, 8), out.shape
    np.testing.assert_allclose(np.asarray(out), np.asarray(ref), rtol=1e-5, atol=1e-5)
    print("KERNEL_OK")
</pallas_src>

<mosaic_0001>
module attributes {stable_mosaic.version = 11 : i64} {
  func.func @conv_relu_pool_kernel(%arg0: i32, %arg1: memref<36xf32, #tpu.memory_space<smem>>, %arg2: memref<1xf32, #tpu.memory_space<smem>>, %arg3: memref<9x10x120xf32, #tpu.memory_space<vmem>>, %arg4: memref<8x118xf32, #tpu.memory_space<vmem>>) attributes {dimension_semantics = [#tpu.dimension_semantics<arbitrary>], iteration_bounds = array<i64: 1>, scalar_prefetch = 0 : i64, scratch_operands = 0 : i64, tpu.core_type = #tpu.core_type<tc>, window_params = [{transform_indices = @transform_0, window_bounds = array<i64: 36>}, {transform_indices = @transform_1, window_bounds = array<i64: 1>}, {pipeline_mode = #tpu.pipeline_mode<synchronous>, transform_indices = @transform_2, window_bounds = array<i64: 9, 10, 120>}, {pipeline_mode = #tpu.pipeline_mode<synchronous>, transform_indices = @transform_3, window_bounds = array<i64: 8, 118>}]} {
    %c0 = arith.constant 0 : index
    %c0_0 = arith.constant 0 : index
    %c0_1 = arith.constant 0 : index
    %0 = vector.load %arg3[%c0, %c0_0, %c0_1] : memref<9x10x120xf32, #tpu.memory_space<vmem>>, vector<9x10x120xf32>
    %1 = vector.extract_strided_slice %0 {offsets = [0, 0, 0], sizes = [1, 10, 120], strides = [1, 1, 1]} : vector<9x10x120xf32> to vector<1x10x120xf32>
    %2 = vector.shape_cast %1 : vector<1x10x120xf32> to vector<10x120xf32>
    %c0_2 = arith.constant 0 : index
    %3 = memref.load %arg1[%c0_2] : memref<36xf32, #tpu.memory_space<smem>>
    %c1 = arith.constant 1 : index
    %4 = memref.load %arg1[%c1] : memref<36xf32, #tpu.memory_space<smem>>
    %c2 = arith.constant 2 : index
    %5 = memref.load %arg1[%c2] : memref<36xf32, #tpu.memory_space<smem>>
    %c3 = arith.constant 3 : index
    %6 = memref.load %arg1[%c3] : memref<36xf32, #tpu.memory_space<smem>>
    %7 = vector.broadcast %3 : f32 to vector<10x120xf32>
    %8 = arith.mulf %2, %7 : vector<10x120xf32>
    %9 = vector.broadcast %4 : f32 to vector<10x120xf32>
    %10 = arith.mulf %2, %9 : vector<10x120xf32>
    %11 = vector.broadcast %5 : f32 to vector<10x120xf32>
    %12 = arith.mulf %2, %11 : vector<10x120xf32>
    %13 = vector.broadcast %6 : f32 to vector<10x120xf32>
    %14 = arith.mulf %2, %13 : vector<10x120xf32>
    %15 = vector.extract_strided_slice %0 {offsets = [1, 0, 0], sizes = [1, 10, 120], strides = [1, 1, 1]} : vector<9x10x120xf32> to vector<1x10x120xf32>
    %16 = vector.shape_cast %15 : vector<1x10x120xf32> to vector<10x120xf32>
    %c4 = arith.constant 4 : index
    %17 = memref.load %arg1[%c4] : memref<36xf32, #tpu.memory_space<smem>>
    %c5 = arith.constant 5 : index
    %18 = memref.load %arg1[%c5] : memref<36xf32, #tpu.memory_space<smem>>
    %c6 = arith.constant 6 : index
    %19 = memref.load %arg1[%c6] : memref<36xf32, #tpu.memory_space<smem>>
    %c7 = arith.constant 7 : index
    %20 = memref.load %arg1[%c7] : memref<36xf32, #tpu.memory_space<smem>>
    %21 = vector.broadcast %17 : f32 to vector<10x120xf32>
    %22 = arith.mulf %16, %21 : vector<10x120xf32>
    %23 = arith.addf %8, %22 : vector<10x120xf32>
    %24 = vector.broadcast %18 : f32 to vector<10x120xf32>
    %25 = arith.mulf %16, %24 : vector<10x120xf32>
    %26 = arith.addf %10, %25 : vector<10x120xf32>
    %27 = vector.broadcast %19 : f32 to vector<10x120xf32>
    %28 = arith.mulf %16, %27 : vector<10x120xf32>
    %29 = arith.addf %12, %28 : vector<10x120xf32>
    %30 = vector.broadcast %20 : f32 to vector<10x120xf32>
    %31 = arith.mulf %16, %30 : vector<10x120xf32>
    %32 = arith.addf %14, %31 : vector<10x120xf32>
    %33 = vector.extract_strided_slice %0 {offsets = [2, 0, 0], sizes = [1, 10, 120], strides = [1, 1, 1]} : vector<9x10x120xf32> to vector<1x10x120xf32>
    %34 = vector.shape_cast %33 : vector<1x10x120xf32> to vector<10x120xf32>
    %c8 = arith.constant 8 : index
    %35 = memref.load %arg1[%c8] : memref<36xf32, #tpu.memory_space<smem>>
    %c9 = arith.constant 9 : index
    %36 = memref.load %arg1[%c9] : memref<36xf32, #tpu.memory_space<smem>>
    %c10 = arith.constant 10 : index
    %37 = memref.load %arg1[%c10] : memref<36xf32, #tpu.memory_space<smem>>
    %c11 = arith.constant 11 : index
    %38 = memref.load %arg1[%c11] : memref<36xf32, #tpu.memory_space<smem>>
    %39 = vector.broadcast %35 : f32 to vector<10x120xf32>
    %40 = arith.mulf %34, %39 : vector<10x120xf32>
    %41 = arith.addf %23, %40 : vector<10x120xf32>
    %42 = vector.broadcast %36 : f32 to vector<10x120xf32>
    %43 = arith.mulf %34, %42 : vector<10x120xf32>
    %44 = arith.addf %26, %43 : vector<10x120xf32>
    %45 = vector.broadcast %37 : f32 to vector<10x120xf32>
    %46 = arith.mulf %34, %45 : vector<10x120xf32>
    %47 = arith.addf %29, %46 : vector<10x120xf32>
    %48 = vector.broadcast %38 : f32 to vector<10x120xf32>
    %49 = arith.mulf %34, %48 : vector<10x120xf32>
    %50 = arith.addf %32, %49 : vector<10x120xf32>
    %51 = vector.extract_strided_slice %0 {offsets = [3, 0, 0], sizes = [1, 10, 120], strides = [1, 1, 1]} : vector<9x10x120xf32> to vector<1x10x120xf32>
    %52 = vector.shape_cast %51 : vector<1x10x120xf32> to vector<10x120xf32>
    %c12 = arith.constant 12 : index
    %53 = memref.load %arg1[%c12] : memref<36xf32, #tpu.memory_space<smem>>
    %c13 = arith.constant 13 : index
    %54 = memref.load %arg1[%c13] : memref<36xf32, #tpu.memory_space<smem>>
    %c14 = arith.constant 14 : index
    %55 = memref.load %arg1[%c14] : memref<36xf32, #tpu.memory_space<smem>>
    %c15 = arith.constant 15 : index
    %56 = memref.load %arg1[%c15] : memref<36xf32, #tpu.memory_space<smem>>
    %57 = vector.broadcast %53 : f32 to vector<10x120xf32>
    %58 = arith.mulf %52, %57 : vector<10x120xf32>
    %59 = arith.addf %41, %58 : vector<10x120xf32>
    %60 = vector.broadcast %54 : f32 to vector<10x120xf32>
    %61 = arith.mulf %52, %60 : vector<10x120xf32>
    %62 = arith.addf %44, %61 : vector<10x120xf32>
    %63 = vector.broadcast %55 : f32 to vector<10x120xf32>
    %64 = arith.mulf %52, %63 : vector<10x120xf32>
    %65 = arith.addf %47, %64 : vector<10x120xf32>
    %66 = vector.broadcast %56 : f32 to vector<10x120xf32>
    %67 = arith.mulf %52, %66 : vector<10x120xf32>
    %68 = arith.addf %50, %67 : vector<10x120xf32>
    %69 = vector.extract_strided_slice %0 {offsets = [4, 0, 0], sizes = [1, 10, 120], strides = [1, 1, 1]} : vector<9x10x120xf32> to vector<1x10x120xf32>
    %70 = vector.shape_cast %69 : vector<1x10x120xf32> to vector<10x120xf32>
    %c16 = arith.constant 16 : index
    %71 = memref.load %arg1[%c16] : memref<36xf32, #tpu.memory_space<smem>>
    %c17 = arith.constant 17 : index
    %72 = memref.load %arg1[%c17] : memref<36xf32, #tpu.memory_space<smem>>
    %c18 = arith.constant 18 : index
    %73 = memref.load %arg1[%c18] : memref<36xf32, #tpu.memory_space<smem>>
    %c19 = arith.constant 19 : index
    %74 = memref.load %arg1[%c19] : memref<36xf32, #tpu.memory_space<smem>>
    %75 = vector.broadcast %71 : f32 to vector<10x120xf32>
    %76 = arith.mulf %70, %75 : vector<10x120xf32>
    %77 = arith.addf %59, %76 : vector<10x120xf32>
    %78 = vector.broadcast %72 : f32 to vector<10x120xf32>
    %79 = arith.mulf %70, %78 : vector<10x120xf32>
    %80 = arith.addf %62, %79 : vector<10x120xf32>
    %81 = vector.broadcast %73 : f32 to vector<10x120xf32>
    %82 = arith.mulf %70, %81 : vector<10x120xf32>
    %83 = arith.addf %65, %82 : vector<10x120xf32>
    %84 = vector.broadcast %74 : f32 to vector<10x120xf32>
    %85 = arith.mulf %70, %84 : vector<10x120xf32>
    %86 = arith.addf %68, %85 : vector<10x120xf32>
    %87 = vector.extract_strided_slice %0 {offsets = [5, 0, 0], sizes = [1, 10, 120], strides = [1, 1, 1]} : vector<9x10x120xf32> to vector<1x10x120xf32>
    %88 = vector.shape_cast %87 : vector<1x10x120xf32> to vector<10x120xf32>
    %c20 = arith.constant 20 : index
    %89 = memref.load %arg1[%c20] : memref<36xf32, #tpu.memory_space<smem>>
    %c21 = arith.constant 21 : index
    %90 = memref.load %arg1[%c21] : memref<36xf32, #tpu.memory_space<smem>>
    %c22 = arith.constant 22 : index
    %91 = memref.load %arg1[%c22] : memref<36xf32, #tpu.memory_space<smem>>
    %c23 = arith.constant 23 : index
    %92 = memref.load %arg1[%c23] : memref<36xf32, #tpu.memory_space<smem>>
    %93 = vector.broadcast %89 : f32 to vector<10x120xf32>
    %94 = arith.mulf %88, %93 : vector<10x120xf32>
    %95 = arith.addf %77, %94 : vector<10x120xf32>
    %96 = vector.broadcast %90 : f32 to vector<10x120xf32>
    %97 = arith.mulf %88, %96 : vector<10x120xf32>
    %98 = arith.addf %80, %97 : vector<10x120xf32>
    %99 = vector.broadcast %91 : f32 to vector<10x120xf32>
    %100 = arith.mulf %88, %99 : vector<10x120xf32>
    %101 = arith.addf %83, %100 : vector<10x120xf32>
    %102 = vector.broadcast %92 : f32 to vector<10x120xf32>
    %103 = arith.mulf %88, %102 : vector<10x120xf32>
    %104 = arith.addf %86, %103 : vector<10x120xf32>
    %105 = vector.extract_strided_slice %0 {offsets = [6, 0, 0], sizes = [1, 10, 120], strides = [1, 1, 1]} : vector<9x10x120xf32> to vector<1x10x120xf32>
    %106 = vector.shape_cast %105 : vector<1x10x120xf32> to vector<10x120xf32>
    %c24 = arith.constant 24 : index
    %107 = memref.load %arg1[%c24] : memref<36xf32, #tpu.memory_space<smem>>
    %c25 = arith.constant 25 : index
    %108 = memref.load %arg1[%c25] : memref<36xf32, #tpu.memory_space<smem>>
    %c26 = arith.constant 26 : index
    %109 = memref.load %arg1[%c26] : memref<36xf32, #tpu.memory_space<smem>>
    %c27 = arith.constant 27 : index
    %110 = memref.load %arg1[%c27] : memref<36xf32, #tpu.memory_space<smem>>
    %111 = vector.broadcast %107 : f32 to vector<10x120xf32>
    %112 = arith.mulf %106, %111 : vector<10x120xf32>
    %113 = arith.addf %95, %112 : vector<10x120xf32>
    %114 = vector.broadcast %108 : f32 to vector<10x120xf32>
    %115 = arith.mulf %106, %114 : vector<10x120xf32>
    %116 = arith.addf %98, %115 : vector<10x120xf32>
    %117 = vector.broadcast %109 : f32 to vector<10x120xf32>
    %118 = arith.mulf %106, %117 : vector<10x120xf32>
    %119 = arith.addf %101, %118 : vector<10x120xf32>
    %120 = vector.broadcast %110 : f32 to vector<10x120xf32>
    %121 = arith.mulf %106, %120 : vector<10x120xf32>
    %122 = arith.addf %104, %121 : vector<10x120xf32>
    %123 = vector.extract_strided_slice %0 {offsets = [7, 0, 0], sizes = [1, 10, 120], strides = [1, 1, 1]} : vector<9x10x120xf32> to vector<1x10x120xf32>
    %124 = vector.shape_cast %123 : vector<1x10x120xf32> to vector<10x120xf32>
    %c28 = arith.constant 28 : index
    %125 = memref.load %arg1[%c28] : memref<36xf32, #tpu.memory_space<smem>>
    %c29 = arith.constant 29 : index
    %126 = memref.load %arg1[%c29] : memref<36xf32, #tpu.memory_space<smem>>
    %c30 = arith.constant 30 : index
    %127 = memref.load %arg1[%c30] : memref<36xf32, #tpu.memory_space<smem>>
    %c31 = arith.constant 31 : index
    %128 = memref.load %arg1[%c31] : memref<36xf32, #tpu.memory_space<smem>>
    %129 = vector.broadcast %125 : f32 to vector<10x120xf32>
    %130 = arith.mulf %124, %129 : vector<10x120xf32>
    %131 = arith.addf %113, %130 : vector<10x120xf32>
    %132 = vector.broadcast %126 : f32 to vector<10x120xf32>
    %133 = arith.mulf %124, %132 : vector<10x120xf32>
    %134 = arith.addf %116, %133 : vector<10x120xf32>
    %135 = vector.broadcast %127 : f32 to vector<10x120xf32>
    %136 = arith.mulf %124, %135 : vector<10x120xf32>
    %137 = arith.addf %119, %136 : vector<10x120xf32>
    %138 = vector.broadcast %128 : f32 to vector<10x120xf32>
    %139 = arith.mulf %124, %138 : vector<10x120xf32>
    %140 = arith.addf %122, %139 : vector<10x120xf32>
    %141 = vector.extract_strided_slice %0 {offsets = [8, 0, 0], sizes = [1, 10, 120], strides = [1, 1, 1]} : vector<9x10x120xf32> to vector<1x10x120xf32>
    %142 = vector.shape_cast %141 : vector<1x10x120xf32> to vector<10x120xf32>
    %c32 = arith.constant 32 : index
    %143 = memref.load %arg1[%c32] : memref<36xf32, #tpu.memory_space<smem>>
    %c33 = arith.constant 33 : index
    %144 = memref.load %arg1[%c33] : memref<36xf32, #tpu.memory_space<smem>>
    %c34 = arith.constant 34 : index
    %145 = memref.load %arg1[%c34] : memref<36xf32, #tpu.memory_space<smem>>
    %c35 = arith.constant 35 : index
    %146 = memref.load %arg1[%c35] : memref<36xf32, #tpu.memory_space<smem>>
    %147 = vector.broadcast %143 : f32 to vector<10x120xf32>
    %148 = arith.mulf %142, %147 : vector<10x120xf32>
    %149 = arith.addf %131, %148 : vector<10x120xf32>
    %150 = vector.broadcast %144 : f32 to vector<10x120xf32>
    %151 = arith.mulf %142, %150 : vector<10x120xf32>
    %152 = arith.addf %134, %151 : vector<10x120xf32>
    %153 = vector.broadcast %145 : f32 to vector<10x120xf32>
    %154 = arith.mulf %142, %153 : vector<10x120xf32>
    %155 = arith.addf %137, %154 : vector<10x120xf32>
    %156 = vector.broadcast %146 : f32 to vector<10x120xf32>
    %157 = arith.mulf %142, %156 : vector<10x120xf32>
    %158 = arith.addf %140, %157 : vector<10x120xf32>
    %159 = vector.extract_strided_slice %149 {offsets = [0, 0], sizes = [9, 119], strides = [1, 1]} : vector<10x120xf32> to vector<9x119xf32>
    %160 = vector.extract_strided_slice %152 {offsets = [0, 1], sizes = [9, 119], strides = [1, 1]} : vector<10x120xf32> to vector<9x119xf32>
    %161 = arith.addf %159, %160 : vector<9x119xf32>
    %162 = vector.extract_strided_slice %155 {offsets = [1, 0], sizes = [9, 119], strides = [1, 1]} : vector<10x120xf32> to vector<9x119xf32>
    %163 = arith.addf %161, %162 : vector<9x119xf32>
    %164 = vector.extract_strided_slice %158 {offsets = [1, 1], sizes = [9, 119], strides = [1, 1]} : vector<10x120xf32> to vector<9x119xf32>
    %165 = arith.addf %163, %164 : vector<9x119xf32>
    %c0_3 = arith.constant 0 : index
    %166 = memref.load %arg2[%c0_3] : memref<1xf32, #tpu.memory_space<smem>>
    %167 = vector.broadcast %166 : f32 to vector<9x119xf32>
    %168 = arith.addf %165, %167 : vector<9x119xf32>
    %cst = arith.constant 0.000000e+00 : f32
    %169 = vector.broadcast %cst : f32 to vector<9x119xf32>
    %170 = arith.maximumf %168, %169 : vector<9x119xf32>
    %171 = vector.extract_strided_slice %170 {offsets = [0, 0], sizes = [8, 118], strides = [1, 1]} : vector<9x119xf32> to vector<8x118xf32>
    %172 = vector.extract_strided_slice %170 {offsets = [0, 1], sizes = [8, 118], strides = [1, 1]} : vector<9x119xf32> to vector<8x118xf32>
    %173 = arith.maximumf %171, %172 : vector<8x118xf32>
    %174 = vector.extract_strided_slice %170 {offsets = [1, 0], sizes = [8, 118], strides = [1, 1]} : vector<9x119xf32> to vector<8x118xf32>
    %175 = vector.extract_strided_slice %170 {offsets = [1, 1], sizes = [8, 118], strides = [1, 1]} : vector<9x119xf32> to vector<8x118xf32>
    %176 = arith.maximumf %174, %175 : vector<8x118xf32>
    %177 = arith.maximumf %173, %176 : vector<8x118xf32>
    %c0_4 = arith.constant 0 : index
    %c0_5 = arith.constant 0 : index
    %178 = vector.load %arg4[%c0_4, %c0_5] : memref<8x118xf32, #tpu.memory_space<vmem>>, vector<8x118xf32>
    tpu.vector_store %arg4[%c0_4, %c0_5], %177 {strides = array<i32>} : memref<8x118xf32, #tpu.memory_space<vmem>>, vector<8x118xf32>,
    return
  }
  func.func @transform_0(%arg0: i32) -> i32 {
    %c0_i32 = arith.constant 0 : i32
    %c0_i32_0 = arith.constant 0 : i32
    return %c0_i32 : i32
  }
  func.func @transform_1(%arg0: i32) -> i32 {
    %c0_i32 = arith.constant 0 : i32
    %c0_i32_0 = arith.constant 0 : i32
    return %c0_i32 : i32
  }
  func.func @transform_2(%arg0: i32) -> (i32, i32, i32) {
    %c0_i32 = arith.constant 0 : i32
    %c0_i32_0 = arith.constant 0 : i32
    %c0_i32_1 = arith.constant 0 : i32
    %c0_i32_2 = arith.constant 0 : i32
    return %c0_i32, %c0_i32_0, %c0_i32_1 : i32, i32, i32
  }
  func.func @transform_3(%arg0: i32) -> (i32, i32) {
    %c0_i32 = arith.constant 0 : i32
    %c0_i32_0 = arith.constant 0 : i32
    %c0_i32_1 = arith.constant 0 : i32
    return %c0_i32, %c0_i32_0 : i32, i32
  }
}

</mosaic_0001>

<bundles_post_ra>
// kernel: c3d_forward.1
= control target key start
LH: loop header
LB: loop body
LE: loop exit
PB: predicated region body
PF: predicated region fallthrough
CT: control target
= control target key end

     0   :  { %9 = vsyncpa [#allocation4], 0  ;;  %s708_s0 = inlined_call_operand.vmem [shape: f32[36], index: 0, kind: input, shape index: {}]   ;;  %s709_s1 = inlined_call_operand.<no memory space> [shape: f32[1], index: 1, kind: input, shape index: {}]   ;;  %s710_s2 = inlined_call_operand.vmem [shape: f32[9,10,120], index: 2, kind: input, shape index: {}]   ;;  %s711_s3 = inlined_call_operand.vmem [shape: f32[8,118], index: 3, kind: output, shape index: {}]  }
   0x1   :  { %s16_s14 = sshll.u32 %s708_s0, 4  ;;  %s17_s14 = int_to_ptr.vmem [resolvable:$true] %s16_s14 }
   0x2   :  { %s354_s15 = scalar_lea.vmem %s17_s14, 16  ;;  %p359_p1 = scmp.lt.s32.totalorder %s17_s14, %s17_s14 }
   0x3   :  { %p355_p0 = scmp.ne.s32.totalorder %s17_s14, %s354_s15  ;;  %p360_p2 = scmp.lt.s32.totalorder %s354_s15, %s354_s15 }
   0x5   :  { %p361_p3 = por %p360_p2, %p359_p1 }
   0x7   :  { %p362_p4 = pnand %p361_p3, %p355_p0 }
   0x9   :  { %365 = shalt.err (!%p362_p4)
}
   0xa   :  { %s368_s16 = smov [#allocation3]  }
   0xb   :  { %19 = dma.vmem_to_smem %s17_s14, 16, %s368_s16, [#allocation4]  }
   0xc   :  { %366 = dma.done.wait [#allocation4], 16  }
   0xd   :  { %367 = vsyncadd [#allocation4], 4294967280 }
   0xe   :  { %27 = sfence }
   0xf   :  { %s317_s17 = sld [smem:[#allocation3 + $0x1]]  ;;  %s321_s18 = sld [smem:[#allocation3 + $0x5]]  ;;  %v396_v0 = vld [vmem:[%s710_s2] sm:$0xff]  ;;  %v403_v1 = vld [vmem:[%s710_s2 + $0x10] sm:$0xff]  ;;  %v444_v10 = vld [vmem:[%s710_s2 + $0x8] sm:$0x3] }
  0x10   :  { %s398_s0 = sld [smem:[#allocation3 + $0x9]]  ;;  %s405_s23 = sld [smem:[#allocation3 + $0xd]]  ;;  %v417_v4 = vld [vmem:[%s710_s2 + $0x20] sm:$0xff]  ;;  %v429_v7 = vld [vmem:[%s710_s2 + $0x30] sm:$0xff]  ;;  %v449_v11 = vld [vmem:[%s710_s2 + $0x18] sm:$0x3] }
  0x11   :  { %s407_s24 = sld [smem:[#allocation3 + $0x11]]  ;;  %s410_s25 = sld [smem:[#allocation3 + $0x15]]  ;;  %v434_v8 = vld [vmem:[%s710_s2 + $0x40] sm:$0xff]  ;;  %v457_v14 = vld [vmem:[%s710_s2 + $0x50] sm:$0xff]  ;;  %v490_v28 = vld [vmem:[%s710_s2 + $0x28] sm:$0x3] }
  0x12   :  { %s412_s26 = sld [smem:[#allocation3 + $0x19]]  ;;  %s419_s29 = sld [smem:[#allocation3 + $0x1d]]  ;;  %v470_v19 = vld [vmem:[%s710_s2 + $0x60] sm:$0xff]  ;;  %v475_v20 = vld [vmem:[%s710_s2 + $0x70] sm:$0xff]  ;;  %v518_v43 = vld [vmem:[%s710_s2 + $0x38] sm:$0x3] }
  0x13   :  { %s421_s30 = sld [smem:[#allocation3 + $0x21]]  ;;  %s424_s4 = sld [smem:[#allocation3 + $0x3]]  ;;  %v482_v24 = vld [vmem:[%s710_s2 + $0x80] sm:$0xff]  ;;  %v526_v48 = vld [vmem:[%s710_s2 + $0x48] sm:$0x3]  ;;  %vm266_vm0 = vcmask 1046528  }
  0x14   :  { %s437_s9 = sld [smem:[#allocation3 + $0x7]]  ;;  %s439_s10 = sld [smem:[#allocation3 + $0xb]]  ;;  %v535_v53 = vld [vmem:[%s710_s2 + $0x58] sm:$0x3]  ;;  %vm310_vm1 = vcmask 965632  }
  0x15   :  { %v53_v2 = vstv %s317_s17  ;;  %v71_v5 = vstv %s321_s18  ;;  %s452_s15 = sld [smem:[#allocation3 + $0xf]]  ;;  %s463_s18 = sld [smem:[#allocation3 + $0x13]] }
  0x16   :  { %v54_v3 = vmul.f32 %v53_v2, %v396_v0  ;;  %v72_v6 = vmul.f32 %v71_v5, %v403_v1  ;;  %v95_v9 = vstv %s398_s0  ;;  %v55_v15 = vmul.f32 %v53_v2, %v444_v10  ;;  %s465_s19 = sld [smem:[#allocation3 + $0x17]]  ;;  %s498_s5 = sld [smem:[#allocation3 + $0x1b]] }
  0x17   :  { %v96_v13 = vmul.f32 %v95_v9, %v417_v4  ;;  %v73_v16 = vmul.f32 %v71_v5, %v449_v11  ;;  %v119_v17 = vstv %s405_s23  ;;  %v143_v18 = vstv %s407_s24  ;;  %s513_s6 = sld [smem:[#allocation3 + $0x23]]  ;;  %s538_s12 = sld [smem:[#allocation3 + $0x4]]  ;;  %v554_v5 = vld [vmem:[%s710_s2 + $0x68] sm:$0x3] }
  0x18   :  { %v74_v12 = vadd.f32 %v72_v6, %v54_v3  ;;  %v120_v22 = vmul.f32 %v119_v17, %v429_v7  ;;  %v144_v23 = vmul.f32 %v143_v18, %v434_v8  ;;  %v167_v25 = vstv %s410_s25  ;;  %s507_s25 = sld [smem:[#allocation3 + $0x1f]]  ;;  %s544_s13 = sld [smem:[#allocation3]] }
  0x19   :  { %v191_v26 = vstv %s412_s26  ;;  %v215_v27 = vstv %s419_s29  ;;  %v168_v30 = vmul.f32 %v167_v25, %v457_v14  ;;  %v97_v31 = vmul.f32 %v95_v9, %v490_v28  ;;  %s546_s14 = sld [smem:[#allocation3 + $0x8]]  ;;  %s570_s0 = sld [smem:[#allocation3 + $0x14]] }
  0x1a   :  { %v98_v21 = vadd.f32 %v96_v13, %v74_v12  ;;  %v192_v32 = vmul.f32 %v191_v26, %v470_v19  ;;  %v239_v33 = vstv %s421_s30  ;;  %v75_v34 = vadd.f32 %v73_v16, %v55_v15  ;;  %v564_v15 = vld [vmem:[%s710_s2 + $0x78] sm:$0x3]  ;;  %s572_s21 = sld [smem:[#allocation3 + $0x2]]  ;;  %s369_s24 = smov 127  }
  0x1b   :  { %v216_v36 = vmul.f32 %v215_v27, %v475_v20  ;;  %v240_v37 = vmul.f32 %v239_v33, %v482_v24  ;;  %v59_v38 = vstv %s424_s4  ;;  %v81_v41 = vstv %s437_s9  ;;  %s591_s27 = sld [smem:[#allocation3 + $0xa]]  ;;  %s594_s26 = sld [smem:[#allocation3 + $0xe]] }
  0x1c   :  { %v122_v29 = vadd.f32 %v120_v22, %v98_v21  ;;  %v60_v39 = vmul.f32 %v59_v38, %v396_v0  ;;  %v61_v40 = vmul.f32 %v59_v38, %v444_v10  ;;  %v105_v42 = vstv %s439_s10  ;;  %s600_s29 = sld [smem:[#allocation3 + $0x18]]  ;;  %s603_s28 = sld [smem:[#allocation3 + $0x1c]] }
  0x1d   :  { %v82_v45 = vmul.f32 %v81_v41, %v403_v1  ;;  %v83_v46 = vmul.f32 %v81_v41, %v449_v11  ;;  %v106_v47 = vmul.f32 %v105_v42, %v417_v4  ;;  %v107_v49 = vmul.f32 %v105_v42, %v490_v28  ;;  %s632_s30 = sld [smem:[#allocation3 + $0x1a]]  ;;  %s638_s7 = sld [smem:[#allocation3 + $0x1e]] }
  0x1e   :  { %v146_v35 = vadd.f32 %v144_v23, %v122_v29  ;;  %v129_v50 = vstv %s452_s15  ;;  %v153_v51 = vstv %s463_s18  ;;  %v177_v52 = vstv %s465_s19  ;;  %s549_s15 = sld [smem:[#allocation3 + $0xc]]  ;;  %s559_s18 = sld [smem:[#allocation3 + $0x10]] }
  0x1f   :  { %v84_v55 = vadd.f32 %v82_v45, %v60_v39  ;;  %v85_v56 = vadd.f32 %v83_v46, %v61_v40  ;;  %v130_v57 = vmul.f32 %v129_v50, %v429_v7  ;;  %v121_v58 = vmul.f32 %v119_v17, %v518_v43  ;;  %s650_s8 = sld [smem:[#allocation3 + $0x22]] }
  0x20   :  { %v170_v44 = vadd.f32 %v168_v30, %v146_v35  ;;  %v145_v59 = vmul.f32 %v143_v18, %v526_v48  ;;  %v131_v60 = vmul.f32 %v129_v50, %v518_v43  ;;  %v154_v61 = vmul.f32 %v153_v51, %v434_v8  ;;  %v577_v30 = vld [vmem:[%s710_s2 + $0x88] sm:$0x3]  ;;  %s589_s2 = sld [smem:[#allocation3 + $0x6]] }
  0x21   :  { %v108_v63 = vadd.f32 %v106_v47, %v84_v55  ;;  %v109_v2 = vadd.f32 %v107_v49, %v85_v56  ;;  %v155_v3 = vmul.f32 %v153_v51, %v526_v48  ;;  %v178_v6 = vmul.f32 %v177_v52, %v457_v14 }
  0x22   :  { %v194_v54 = vadd.f32 %v192_v32, %v170_v44  ;;  %v179_v9 = vmul.f32 %v177_v52, %v535_v53  ;;  %v201_v12 = vstv %s498_s5  ;;  %v99_v13 = vadd.f32 %v97_v31, %v75_v34  ;;  %s605_s5 = sld [smem:[#allocation3 + $0x12]] }
  0x23   :  { %v132_v17 = vadd.f32 %v130_v57, %v108_v63  ;;  %v133_v18 = vadd.f32 %v131_v60, %v109_v2  ;;  %v225_v21 = vstv %s507_s25  ;;  %v169_v22 = vmul.f32 %v167_v25, %v535_v53  ;;  %s614_s25 = sld [smem:[#allocation3 + $0x20]] }
  0x24   :  { %v218_v62 = vadd.f32 %v216_v36, %v194_v54  ;;  %v202_v23 = vmul.f32 %v201_v12, %v470_v19  ;;  %v249_v29 = vstv %s513_s6  ;;  %v203_v25 = vmul.f32 %v201_v12, %v554_v5  ;;  %s619_s6 = sld [smem:[#allocation3 + $0x16]] }
  0x25   :  { %v156_v31 = vadd.f32 %v154_v61, %v132_v17  ;;  %v157_v32 = vadd.f32 %v155_v3, %v133_v18  ;;  %v123_v34 = vadd.f32 %v121_v58, %v99_v13  ;;  %v193_v35 = vmul.f32 %v191_v26, %v554_v5 }
  0x26   :  { %v242_v16 = vadd.f32 %v240_v37, %v218_v62  ;;  %v217_v36 = vmul.f32 %v215_v27, %v564_v15  ;;  %v226_v37 = vmul.f32 %v225_v21, %v475_v20  ;;  %v227_v38 = vmul.f32 %v225_v21, %v564_v15 }
  0x27   :  { %v180_v39 = vadd.f32 %v178_v6, %v156_v31  ;;  %v181_v40 = vadd.f32 %v179_v9, %v157_v32  ;;  %v147_v41 = vadd.f32 %v145_v59, %v123_v34  ;;  %v66_v42 = vstv %s538_s12 }
  0x28   :  { %256 = vrot.lane.b32.xlu0 %v242_v16, %s369_s24  ;;  %v250_v26 = vmul.f32 %v249_v29, %v482_v24  ;;  %v251_v27 = vmul.f32 %v249_v29, %v577_v30  ;;  %v50_v44 = vstv %s544_s13  ;;  %v90_v45 = vstv %s546_s14 }
  0x29   :  { %v204_v46 = vadd.f32 %v202_v23, %v180_v39  ;;  %v205_v47 = vadd.f32 %v203_v25, %v181_v40  ;;  %v171_v49 = vadd.f32 %v169_v22, %v147_v41  ;;  %v114_v50 = vstv %s549_s15 }
  0x2a   :  { %v241_v51 = vmul.f32 %v239_v33, %v577_v30  ;;  %v67_v52 = vmul.f32 %v66_v42, %v403_v1  ;;  %v138_v54 = vstv %s559_s18  ;;  %v91_v58 = vmul.f32 %v90_v45, %v417_v4 }
  0x2b   :  { %v228_v55 = vadd.f32 %v226_v37, %v204_v46  ;;  %v229_v56 = vadd.f32 %v227_v38, %v205_v47  ;;  %v195_v57 = vadd.f32 %v193_v35, %v171_v49  ;;  %v115_v33 = vmul.f32 %v114_v50, %v429_v7 }
  0x2c   :  { %v162_v59 = vstv %s570_s0  ;;  %v51_v60 = vmul.f32 %v50_v44, %v396_v0  ;;  %v56_v61 = vstv %s572_s21  ;;  %v139_v3 = vmul.f32 %v138_v54, %v434_v8 }
  0x2d   :  { %v252_v62 = vadd.f32 %v250_v26, %v228_v55  ;;  %v253_v63 = vadd.f32 %v251_v27, %v229_v56  ;;  %v219_v2 = vadd.f32 %v217_v36, %v195_v57  ;;  %v58_v9 = vmul.f32 %v56_v61, %v444_v10 }
  0x2e   :  { %v69_v6 = vadd.f32 %v67_v52, %v51_v60  ;;  %v76_v12 = vstv %s589_s2  ;;  %v100_v13 = vstv %s591_s27  ;;  %v124_v21 = vstv %s594_s26 }
  0x2f   :  { %v276_v16 = vrot.slane %v252_v62, 1  ;;  %v277_v17 = vrot.slane %v253_v63, 1  ;;  %v243_v18 = vadd.f32 %v241_v51, %v219_v2  ;;  %v186_v22 = vstv %s600_s29 }
  0x30   :  { %v93_v23 = vadd.f32 %v91_v58, %v69_v6  ;;  %v78_v29 = vmul.f32 %v76_v12, %v449_v11  ;;  %v102_v31 = vmul.f32 %v100_v13, %v490_v28  ;;  %v163_v25 = vmul.f32 %v162_v59, %v457_v14 }
  0x31   :  { %v278_v32 = vsel %vm266_vm0, %v276_v16, %v277_v17  ;;  %258 = vrot.lane.b32.xlu0 %v243_v18, %s369_s24  ;;  %v210_v34 = vstv %s603_s28  ;;  %v148_v35 = vstv %s605_s5  ;;  %v234_v36 = vstv %s614_s25 }
  0x32   :  { %279 = vrot.lane.b32.xlu1 %v278_v32, %s369_s24  ;;  %v117_v37 = vadd.f32 %v115_v33, %v93_v23  ;;  %v80_v38 = vadd.f32 %v78_v29, %v58_v9  ;;  %v126_v39 = vmul.f32 %v124_v21, %v518_v43  ;;  %v187_v40 = vmul.f32 %v186_v22, %v470_v19 }
  0x33   :  { %v172_v41 = vstv %s619_s6  ;;  %v211_v26 = vmul.f32 %v210_v34, %v475_v20  ;;  %v150_v47 = vmul.f32 %v148_v35, %v526_v48  ;;  %v235_v49 = vmul.f32 %v234_v36, %v482_v24 }
  0x34   :  { %v141_v27 = vadd.f32 %v139_v3, %v117_v37  ;;  %v104_v46 = vadd.f32 %v102_v31, %v80_v38  ;;  %v77_v51 = vmul.f32 %v76_v12, %v403_v1  ;;  %v101_v52 = vmul.f32 %v100_v13, %v417_v4 }
  0x35   :  { %v196_v55 = vstv %s632_s30  ;;  %v125_v57 = vmul.f32 %v124_v21, %v429_v7  ;;  %v174_v33 = vmul.f32 %v172_v41, %v535_v53  ;;  %v220_v60 = vstv %s638_s7 }
  0x36   :  { %281 = vrot.lane.b32.xlu1 %v277_v17, %s369_s24  ;;  %v165_v56 = vadd.f32 %v163_v25, %v141_v27  ;;  %v128_v58 = vadd.f32 %v126_v39, %v104_v46  ;;  %v57_v62 = vmul.f32 %v56_v61, %v396_v0  ;;  %v52_v63 = vmul.f32 %v50_v44, %v444_v10 }
  0x37   :  { %v68_v1 = vmul.f32 %v66_v42, %v449_v11  ;;  %v198_v3 = vmul.f32 %v196_v55, %v554_v5  ;;  %v92_v7 = vmul.f32 %v90_v45, %v490_v28  ;;  %v244_v6 = vstv %s650_s8 }
  0x38   :  { %v189_v4 = vadd.f32 %v187_v40, %v165_v56  ;;  %v152_v2 = vadd.f32 %v150_v47, %v128_v58  ;;  %v79_v9 = vadd.f32 %v77_v51, %v57_v62  ;;  %v116_v0 = vmul.f32 %v114_v50, %v518_v43 }
  0x39   :  { %v70_v12 = vadd.f32 %v68_v1, %v52_v63  ;;  %v222_v44 = vmul.f32 %v220_v60, %v564_v15  ;;  %v149_v11 = vmul.f32 %v148_v35, %v434_v8  ;;  %v140_v16 = vmul.f32 %v138_v54, %v526_v48 }
  0x3a   :  { %v213_v61 = vadd.f32 %v211_v26, %v189_v4  ;;  %v176_v10 = vadd.f32 %v174_v33, %v152_v2  ;;  %v103_v42 = vadd.f32 %v101_v52, %v79_v9  ;;  %v246_v45 = vmul.f32 %v244_v6, %v577_v30 }
  0x3b   :  { %v94_v13 = vadd.f32 %v92_v7, %v70_v12  ;;  %v173_v18 = vmul.f32 %v172_v41, %v457_v14  ;;  %v164_v43 = vmul.f32 %v162_v59, %v535_v53  ;;  %v197_v29 = vmul.f32 %v196_v55, %v470_v19 }
  0x3c   :  { %v237_v17 = vadd.f32 %v235_v49, %v213_v61  ;;  %v200_v28 = vadd.f32 %v198_v3, %v176_v10  ;;  %v127_v21 = vadd.f32 %v125_v57, %v103_v42  ;;  %v188_v32 = vmul.f32 %v186_v22, %v554_v5 }
  0x3d   :  { %v118_v23 = vadd.f32 %v116_v0, %v94_v13  ;;  %v221_v48 = vmul.f32 %v220_v60, %v475_v20  ;;  %v212_v37 = vmul.f32 %v210_v34, %v564_v15  ;;  %v245_v14 = vmul.f32 %v244_v6, %v482_v24 }
  0x3e   :  { %v224_v50 = vadd.f32 %v222_v44, %v200_v28  ;;  %v151_v8 = vadd.f32 %v149_v11, %v127_v21  ;;  %v236_v53 = vmul.f32 %v234_v36, %v577_v30  ;;  %v288_v24 = vstv %s709_s1 }
  0x3f   :  { %v142_v31 = vadd.f32 %v140_v16, %v118_v23 }
  0x40   :  { %v248_v25 = vadd.f32 %v246_v45, %v224_v50  ;;  %v175_v54 = vadd.f32 %v173_v18, %v151_v8 }
  0x41   :  { %v166_v35 = vadd.f32 %v164_v43, %v142_v31 }
  0x42   :  { %v199_v38 = vadd.f32 %v197_v29, %v175_v54  ;;  %v268_v19 = vrot.slane %v248_v25, 1 }
  0x43   :  { %v190_v39 = vadd.f32 %v188_v32, %v166_v35 }
  0x44   :  { %v223_v59 = vadd.f32 %v221_v48, %v199_v38 }
  0x45   :  { %v214_v40 = vadd.f32 %v212_v37, %v190_v39 }
  0x46   :  { %v247_v41 = vadd.f32 %v245_v14, %v223_v59 }
  0x47   :  { %v238_v26 = vadd.f32 %v236_v53, %v214_v40 }
  0x48   :  { %v267_v27 = vrot.slane %v247_v41, 1 }
  0x4a   :  { %v269_v5 = vsel %vm266_vm0, %v267_v27, %v268_v19 }
  0x9a   :  { %v257_v22 = vpop.permute.xlu0 %256 }
  0x9b   :  { %v262_v20 = vadd.f32 %v257_v22, %v237_v17 }
  0x9d   :  { %v272_v46 = vadd.f32 %v269_v5, %v262_v20 }
  0xa3   :  { %v259_v47 = vpop.permute.xlu0 %258 }
  0xa4   :  { %v280_v15 = vpop.permute.xlu1 %279  ;;  %v263_v34 = vadd.f32 %v259_v47, %v238_v26 }
  0xa5   :  { %v285_v49 = vadd.f32 %v280_v15, %v272_v46 }
  0xa6   :  { %v273_v30 = vadd.f32 %v268_v19, %v263_v34 }
  0xa7   :  { %v289_v36 = vadd.f32 %v288_v24, %v285_v49 }
  0xa8   :  { %v282_v51 = vpop.permute.xlu1 %281 }
  0xa9   :  { %v291_v52 = vmax.f32 %v289_v36, 0.0  ;;  %v286_v55 = vadd.f32 %v282_v51, %v273_v30 }
  0xab   :  { %v290_v56 = vadd.f32 %v288_v24, %v286_v55  ;;  %294 = vrot.lane.b32.xlu0 %v291_v52, %s369_s24 }
  0xad   :  { %v292_v57 = vmax.f32 %v290_v56, 0.0 }
  0xaf   :  { %299 = vrot.lane.b32.xlu1 %v292_v57, %s369_s24 }
 0x11d   :  { %v295_v58 = vpop.permute.xlu0 %294 }
 0x11e   :  { %v297_v33 = vmax.f32 %v291_v52, %v295_v58 }
 0x120   :  { %v305_v63 = vrot.slane %v297_v33, 1 }
 0x121   :  { %v300_v60 = vpop.permute.xlu1 %299 }
 0x122   :  { %v302_v62 = vmax.f32 %v292_v57, %v300_v60 }
 0x124   :  { %v306_v1 = vrot.slane %v302_v62, 1 }
 0x126   :  { %v307_v4 = vsel %vm266_vm0, %v305_v63, %v306_v1 }
 0x127   :  { %v309_v2 = vmax.f32 %v297_v33, %v307_v4 }
 0x129   :  { %311 = vst.msk [vmem:[%s711_s3] sm:$0xff] %vm310_vm1, %v309_v2 }
 0x12a   :  { %316 = vsyncpa [#allocation4], 1 }

</bundles_post_ra>
